<compile_context>
chip_gen: v7x
topology: tpu7x:2x2x1
jax: 0.10.0
libtpu: 0.0.40
codegen_flags: <defaults>
</compile_context>

<pallas_src>
import functools

import jax
import jax.numpy as jnp
from jax import lax
from jax.experimental import pallas as pl
from jax.experimental.pallas import tpu as pltpu


def _tpu_hints():
    """Best-effort hardware hints; safe conservative fallbacks if query fails."""
    phys_vmem = 64 << 20          # smallest per-core VMEM across v5e/v6e/v7x
    newer_than_v5 = False         # conservative: no bf16 EUP, 128-wide MXU
    try:
        info = pltpu.get_tpu_info()
        phys_vmem = int(getattr(info, "vmem_capacity_bytes", phys_vmem))
        ver = ""
        for attr in ("chip_version", "version", "chip", "name"):
            v = getattr(info, attr, None)
            if v is not None:
                ver = str(v).lower()
                break
        if ver:
            newer_than_v5 = not any(t in ver for t in ("v2", "v3", "v4", "v5"))
    except Exception:
        pass
    return phys_vmem, newer_than_v5


def _pick_key_tile(hw, tile_budget_bytes, granularity, bytes_per_elem,
                   cap_elems=1024):
    """Largest key tile whose simultaneously-live (KT, HW) score+prob tiles fit
    `tile_budget_bytes`; prefers MXU-granularity-aligned divisors of HW and
    never falls back to the full (HW, HW) tile for awkward HW."""
    max_kt = min(hw, cap_elems,
                 max(1, tile_budget_bytes // (bytes_per_elem * hw)))
    max_kt = max(max_kt, min(hw, granularity))
    if hw % granularity == 0:
        kt = max(granularity, (max_kt // granularity) * granularity)
        while kt > granularity and hw % kt != 0:
            kt -= granularity
        return kt
    # HW not tile-aligned: largest divisor of HW that fits, preferring
    # sublane-aligned (multiple-of-8) divisors.
    best, best8 = 1, 0
    d = 1
    while d * d <= hw:
        if hw % d == 0:
            for cand in (d, hw // d):
                if cand <= max_kt:
                    best = max(best, cand)
                    if cand % 8 == 0:
                        best8 = max(best8, cand)
        d += 1
    return best8 if best8 else best


def _gsa_kernel(x_ref, g_ref, wqkv_ref, bqkv_ref, watt_ref, batt_ref,
                o_ref,
                q_scr, k_scr, v_scr, acc_scr,
                *, key_tile, num_key_tiles, cr, mm_dtype, exp_dtype, unroll):
    """One batch element per grid step.

    Layouts (channel on sublanes, HW on lanes):
      x_ref                 : (1, C, HW)   matmul dtype
      g_ref / o_ref         : (1, C, HW)   f32
      wqkv_ref              : (3*Crp, C)   fused + zero-padded q/k/v weights
      bqkv_ref              : (3*Crp, 1)   fused q/k/v biases; row 2*Crp+Cr = 1
      watt_ref              : (C, Crp)     output 1x1 conv weights (padded cols)
      batt_ref              : (C, 1)       output bias + 1 (folds residual `+g`)
      q/k/v_scr             : (Crp, HW)    matmul-dtype scratch (v has ones row)
      acc_scr               : (Crp, HW)    f32 accumulator (row `cr` = denom)
    """
    crp = k_scr.shape[0]
    x = x_ref[0]                                        # (C, HW)

    # Fused Q/K/V 1x1 convolutions: one MXU matmul, then a single cast into
    # matmul-dtype scratch (the f32 temporary dies before the key loop).
    qkv = jnp.dot(wqkv_ref[...], x,
                  preferred_element_type=jnp.float32) + bqkv_ref[...]
    q_scr[...] = qkv[0:crp].astype(mm_dtype)
    k_scr[...] = qkv[crp:2 * crp].astype(mm_dtype)
    v_scr[...] = qkv[2 * crp:3 * crp].astype(mm_dtype)  # row `cr` == 1.0

    acc_scr[...] = jnp.zeros_like(acc_scr)

    def body(step, m):                                  # m: (1, 1) running max
        i0 = pl.multiple_of(step * key_tile, key_tile)
        k_blk = k_scr[:, pl.ds(i0, key_tile)]           # (Crp, KT)
        v_blk = v_scr[:, pl.ds(i0, key_tile)]           # (Crp, KT)

        # Score tile s[i, j] = sum_c k[c, i] * q[c, j]  -> (KT, HW), f32 acc.
        s_blk = lax.dot_general(
            k_blk, q_scr[...], (((0,), (0,)), ((), ())),
            preferred_element_type=jnp.float32)

        # Online softmax over the FLAT HW*HW score set: global scalar max.
        m_new = jnp.maximum(m, jnp.max(s_blk, axis=(0, 1), keepdims=True))
        alpha = jnp.exp(m - m_new)
        p_blk = jnp.exp((s_blk - m_new).astype(exp_dtype))

        # att[c, j] += sum_i v[c, i] * p[i, j]; the ones row of v makes the
        # accumulator row `cr` collect sum_i p[i, j] (softmax denominator) for
        # free on the MXU, with the same alpha rescaling.
        acc_scr[...] = acc_scr[...] * alpha + jnp.dot(
            v_blk, p_blk.astype(mm_dtype), preferred_element_type=jnp.float32)
        return m_new

    m0 = jnp.full((1, 1), -jnp.inf, dtype=jnp.float32)
    lax.fori_loop(0, num_key_tiles, body, m0, unroll=unroll)

    # Softmax denominator = lane-sum of the ones-row of the accumulator.
    l_final = jnp.sum(acc_scr[cr:cr + 1, :], axis=1, keepdims=True)   # (1, 1)
    inv_l = pl.reciprocal(l_final, approx=False)

    # Deferred normalization: scale the small (Crp, HW) accumulator once.
    att = (acc_scr[...] * inv_l).astype(mm_dtype)

    # Final 1x1 conv; bias already contains (+1) so o = g*(watt@att + batt + 1)
    # == g * att_full + g.  watt's padded columns are zero, so the ones row and
    # the padded channels never leak into the output.
    att_full_p1 = jnp.dot(watt_ref[...], att,
                          preferred_element_type=jnp.float32) + batt_ref[...]
    o_ref[0] = g_ref[0] * att_full_p1


def global_spatial_attention(feature_maps, global_channel_output, params, *,
                             key_tile=None, matmul_dtype=jnp.bfloat16,
                             exp_dtype=None):
    """feature_maps, global_channel_output: (N, C, H, W) NCHW float32."""
    N, C, H, W = feature_maps.shape
    HW = H * W
    Cr = params["wq"].shape[0]
    # Reserve one extra v row (the MXU-denominator "ones" row) and pad the
    # reduced channel count to a sublane tile.
    Crp = -(-(Cr + 1) // 8) * 8

    phys_vmem, newer_than_v5 = _tpu_hints()
    if exp_dtype is None:
        # v6e / v7x have a bf16 EUP (~2x exp throughput); v5e does not.
        exp_dtype = jnp.bfloat16 if newer_than_v5 else jnp.float32
    mm_bytes = jnp.dtype(matmul_dtype).itemsize
    exp_bytes = jnp.dtype(exp_dtype).itemsize
    tile_bpe = 4 + exp_bytes + mm_bytes      # live s (f32) + p (exp) + p (mm)

    f32 = jnp.float32
    vmem_cap = int(0.85 * phys_vmem)         # never exceed physical VMEM (v7x!)
    # Resident (non-tile) VMEM: double-buffered x/g/o blocks, q/k/v/acc
    # scratch, the fused-qkv f32 temporary and the (small) weights.
    resident = (2 * C * HW * (mm_bytes + 4 + 4)
                + Crp * HW * (3 * mm_bytes + 4)
                + 3 * Crp * HW * 4
                + 2 * mm_bytes * (3 * Crp * C + C * Crp)
                + 4 * (3 * Crp + C) * 4
                + (1 << 20))                 # slack
    tile_budget = max(1 << 20, vmem_cap - resident)

    if key_tile is None:
        key_tile = _pick_key_tile(HW, tile_budget,
                                  granularity=256 if newer_than_v5 else 128,
                                  bytes_per_elem=tile_bpe)
    if HW % key_tile != 0:
        raise ValueError(f"key_tile={key_tile} must divide HW={HW}")
    num_key_tiles = HW // key_tile

    vmem_limit = int(min(max(resident + 2 * key_tile * HW * tile_bpe + (4 << 20),
                             32 << 20),
                         vmem_cap))

    # NCHW -> (N, C, HW): pure reshape; x pre-cast to the matmul dtype so its
    # HBM->VMEM DMA is half-width.  g stays f32 (residual precision).
    x3 = feature_maps.reshape(N, C, HW).astype(matmul_dtype)
    g3 = global_channel_output.reshape(N, C, HW).astype(f32)

    # Fuse + zero-pad projection weights/biases (padded rows contribute 0).
    wqkv = jnp.zeros((3 * Crp, C), f32)
    wqkv = wqkv.at[0 * Crp:0 * Crp + Cr].set(params["wq"].astype(f32))
    wqkv = wqkv.at[1 * Crp:1 * Crp + Cr].set(params["wk"].astype(f32))
    wqkv = wqkv.at[2 * Crp:2 * Crp + Cr].set(params["wv"].astype(f32))
    wqkv = wqkv.astype(matmul_dtype)
    bqkv = jnp.zeros((3 * Crp, 1), f32)
    bqkv = bqkv.at[0 * Crp:0 * Crp + Cr, 0].set(params["bq"].astype(f32))
    bqkv = bqkv.at[1 * Crp:1 * Crp + Cr, 0].set(params["bk"].astype(f32))
    bqkv = bqkv.at[2 * Crp:2 * Crp + Cr, 0].set(params["bv"].astype(f32))
    # MXU softmax denominator: extra v row = zero weights + bias 1.0.
    bqkv = bqkv.at[2 * Crp + Cr, 0].set(1.0)
    watt_p = jnp.zeros((C, Crp), f32).at[:, 0:Cr].set(
        params["watt"].astype(f32)).astype(matmul_dtype)
    batt_p1 = params["batt"].astype(f32).reshape(C, 1) + 1.0   # folds `+ g`

    batch_spec = pl.BlockSpec((1, C, HW), lambda n: (n, 0, 0))
    full2d = lambda a: pl.BlockSpec(a.shape, lambda n: (0, 0))

    cost = pl.CostEstimate(
        flops=int(N * (4 * Crp * HW * HW + 8 * Crp * C * HW
                       + 4 * HW * HW + 8 * C * HW)),
        transcendentals=int(N * HW * HW),
        bytes_accessed=int(N * C * HW * (mm_bytes + 8)
                           + mm_bytes * 4 * Crp * C + 4 * (3 * Crp + 2 * C)))

    kernel = functools.partial(
        _gsa_kernel, key_tile=key_tile, num_key_tiles=num_key_tiles, cr=Cr,
        mm_dtype=matmul_dtype, exp_dtype=exp_dtype,
        unroll=max(1, min(num_key_tiles, 4)))

    out3 = pl.pallas_call(
        kernel,
        out_shape=jax.ShapeDtypeStruct((N, C, HW), f32),
        grid_spec=pltpu.PrefetchScalarGridSpec(
            num_scalar_prefetch=0,
            grid=(N,),
            in_specs=[
                batch_spec,          # x (matmul dtype)
                batch_spec,          # g (f32)
                full2d(wqkv),        # fused q/k/v weights
                full2d(bqkv),        # fused q/k/v biases (+ ones row)
                full2d(watt_p),      # output conv weights (zero-padded cols)
                full2d(batt_p1),     # output conv bias (+1, folds residual)
            ],
            out_specs=batch_spec,
            scratch_shapes=[
                pltpu.VMEM((Crp, HW), matmul_dtype),   # q
                pltpu.VMEM((Crp, HW), matmul_dtype),   # k
                pltpu.VMEM((Crp, HW), matmul_dtype),   # v (row Cr == ones)
                pltpu.VMEM((Crp, HW), f32),            # attention accumulator
            ],
        ),
        compiler_params=pltpu.CompilerParams(
            dimension_semantics=("parallel",),
            vmem_limit_bytes=vmem_limit),
        cost_estimate=cost,
    )(x3, g3, wqkv, bqkv, watt_p, batt_p1)

    return out3.reshape(N, C, H, W)


def reference_forward(feature_maps, global_channel_output, params):
    """Pure-JAX mirror of the PyTorch forward (for correctness check)."""
    def conv1x1(x, w, b):
        return jnp.einsum("nchw,oc->nohw", x, w) + b[None, :, None, None]

    q = conv1x1(feature_maps, params["wq"], params["bq"])
    N, Cr, H, W = q.shape
    q = q.reshape(N, Cr, -1)
    k = conv1x1(feature_maps, params["wk"], params["bk"]).reshape(N, Cr, -1)
    qk = jnp.einsum("nci,ncj->nij", k, q)
    qk = jax.nn.softmax(qk.reshape(N, -1), axis=-1).reshape(N, H * W, H * W)
    v = conv1x1(feature_maps, params["wv"], params["bv"]).reshape(N, Cr, -1)
    att = jnp.einsum("nci,nij->ncj", v, qk).reshape(N, Cr, H, W)
    att = conv1x1(att, params["watt"], params["batt"])
    return global_channel_output * att + global_channel_output


if __name__ == "__main__":
    N, C, Cr, H, W = 2, 4, 2, 16, 16   # HW = 256

    key = jax.random.PRNGKey(0)
    ks = jax.random.split(key, 10)

    feature_maps = jax.random.normal(ks[0], (N, C, H, W), jnp.float32)
    global_channel_output = jax.random.normal(ks[1], (N, C, H, W), jnp.float32)

    params = {
        "wq": 0.1 * jax.random.normal(ks[2], (Cr, C), jnp.float32),
        "bq": 0.1 * jax.random.normal(ks[3], (Cr,), jnp.float32),
        "wk": 0.1 * jax.random.normal(ks[4], (Cr, C), jnp.float32),
        "bk": 0.1 * jax.random.normal(ks[5], (Cr,), jnp.float32),
        "wv": 0.1 * jax.random.normal(ks[6], (Cr, C), jnp.float32),
        "bv": 0.1 * jax.random.normal(ks[7], (Cr,), jnp.float32),
        "watt": 0.1 * jax.random.normal(ks[8], (C, Cr), jnp.float32),
        "batt": 0.1 * jax.random.normal(ks[9], (C,), jnp.float32),
    }

    ref = reference_forward(feature_maps, global_channel_output, params)

    # 1) Exact-math path (f32 MXU, f32 exp), key_tile=128 -> exercises the
    #    2-tile online-softmax loop and the MXU-denominator row; tight tol.
    out_f32 = global_spatial_attention(
        feature_maps, global_channel_output, params, key_tile=128,
        matmul_dtype=jnp.float32, exp_dtype=jnp.float32)
    out_f32 = jax.block_until_ready(out_f32)
    assert out_f32.shape == (N, C, H, W)
    assert jnp.allclose(out_f32, ref, atol=1e-4, rtol=1e-4), "f32 path mismatch"

    # 2) Default fast path (bf16 MXU inputs, auto exp dtype, auto key tile).
    out_fast = global_spatial_attention(feature_maps, global_channel_output,
                                        params)
    out_fast = jax.block_until_ready(out_fast)
    assert out_fast.shape == (N, C, H, W)
    assert jnp.allclose(out_fast, ref, atol=1e-2, rtol=1e-2), \
        "bf16 path mismatch"

    print("KERNEL_OK")
</pallas_src>

<mosaic_0001>
module attributes {stable_mosaic.version = 11 : i64} {
  func.func @_gsa_kernel(%arg0: i32, %arg1: memref<1x4x256xf32, #tpu.memory_space<vmem>>, %arg2: memref<1x4x256xf32, #tpu.memory_space<vmem>>, %arg3: memref<24x4xf32, #tpu.memory_space<vmem>>, %arg4: memref<24x1xf32, #tpu.memory_space<vmem>>, %arg5: memref<4x8xf32, #tpu.memory_space<vmem>>, %arg6: memref<4x1xf32, #tpu.memory_space<vmem>>, %arg7: memref<1x4x256xf32, #tpu.memory_space<vmem>>, %arg8: memref<8x256xf32, #tpu.memory_space<vmem>>, %arg9: memref<8x256xf32, #tpu.memory_space<vmem>>, %arg10: memref<8x256xf32, #tpu.memory_space<vmem>>, %arg11: memref<8x256xf32, #tpu.memory_space<vmem>>) attributes {dimension_semantics = [#tpu.dimension_semantics<parallel>], iteration_bounds = array<i64: 2>, scalar_prefetch = 0 : i64, scratch_operands = 4 : i64, tpu.core_type = #tpu.core_type<tc>, window_params = [{transform_indices = @transform_0, window_bounds = array<i64: 1, 4, 256>}, {transform_indices = @transform_1, window_bounds = array<i64: 1, 4, 256>}, {pipeline_mode = #tpu.pipeline_mode<synchronous>, transform_indices = @transform_2, window_bounds = array<i64: 24, 4>}, {pipeline_mode = #tpu.pipeline_mode<synchronous>, transform_indices = @transform_3, window_bounds = array<i64: 24, 1>}, {pipeline_mode = #tpu.pipeline_mode<synchronous>, transform_indices = @transform_4, window_bounds = array<i64: 4, 8>}, {pipeline_mode = #tpu.pipeline_mode<synchronous>, transform_indices = @transform_5, window_bounds = array<i64: 4, 1>}, {transform_indices = @transform_6, window_bounds = array<i64: 1, 4, 256>}]} {
    %c0 = arith.constant 0 : index
    %c0_0 = arith.constant 0 : index
    %c0_1 = arith.constant 0 : index
    %0 = vector.load %arg1[%c0, %c0_0, %c0_1] : memref<1x4x256xf32, #tpu.memory_space<vmem>>, vector<1x4x256xf32>
    %1 = vector.shape_cast %0 : vector<1x4x256xf32> to vector<4x256xf32>
    %c0_2 = arith.constant 0 : index
    %c0_3 = arith.constant 0 : index
    %2 = vector.load %arg3[%c0_2, %c0_3] : memref<24x4xf32, #tpu.memory_space<vmem>>, vector<24x4xf32>
    %cst = arith.constant dense<0.000000e+00> : vector<24x256xf32>
    %3 = tpu.matmul %2, %1, %cst {dimension_numbers = #tpu.dot_dimension_numbers<[1], [0], [0], [1], [0, 0, 1, 1], [], []>} : vector<24x4xf32>, vector<4x256xf32>, vector<24x256xf32> -> vector<24x256xf32>
    %c0_4 = arith.constant 0 : index
    %c0_5 = arith.constant 0 : index
    %4 = vector.load %arg4[%c0_4, %c0_5] : memref<24x1xf32, #tpu.memory_space<vmem>>, vector<24x1xf32>
    %5 = vector.broadcast %4 : vector<24x1xf32> to vector<24x256xf32>
    %6 = arith.addf %3, %5 : vector<24x256xf32>
    %7 = vector.extract_strided_slice %6 {offsets = [0, 0], sizes = [8, 256], strides = [1, 1]} : vector<24x256xf32> to vector<8x256xf32>
    %c0_6 = arith.constant 0 : index
    %c0_7 = arith.constant 0 : index
    %8 = vector.load %arg8[%c0_6, %c0_7] : memref<8x256xf32, #tpu.memory_space<vmem>>, vector<8x256xf32>
    tpu.vector_store %arg8[%c0_6, %c0_7], %7 {strides = array<i32>} : memref<8x256xf32, #tpu.memory_space<vmem>>, vector<8x256xf32>,
    %9 = vector.extract_strided_slice %6 {offsets = [8, 0], sizes = [8, 256], strides = [1, 1]} : vector<24x256xf32> to vector<8x256xf32>
    %c0_8 = arith.constant 0 : index
    %c0_9 = arith.constant 0 : index
    %10 = vector.load %arg9[%c0_8, %c0_9] : memref<8x256xf32, #tpu.memory_space<vmem>>, vector<8x256xf32>
    tpu.vector_store %arg9[%c0_8, %c0_9], %9 {strides = array<i32>} : memref<8x256xf32, #tpu.memory_space<vmem>>, vector<8x256xf32>,
    %11 = vector.extract_strided_slice %6 {offsets = [16, 0], sizes = [8, 256], strides = [1, 1]} : vector<24x256xf32> to vector<8x256xf32>
    %c0_10 = arith.constant 0 : index
    %c0_11 = arith.constant 0 : index
    %12 = vector.load %arg10[%c0_10, %c0_11] : memref<8x256xf32, #tpu.memory_space<vmem>>, vector<8x256xf32>
    tpu.vector_store %arg10[%c0_10, %c0_11], %11 {strides = array<i32>} : memref<8x256xf32, #tpu.memory_space<vmem>>, vector<8x256xf32>,
    %cst_12 = arith.constant 0.000000e+00 : f32
    %13 = vector.broadcast %cst_12 : f32 to vector<8x256xf32>
    %c0_13 = arith.constant 0 : index
    %c0_14 = arith.constant 0 : index
    %14 = vector.load %arg11[%c0_13, %c0_14] : memref<8x256xf32, #tpu.memory_space<vmem>>, vector<8x256xf32>
    tpu.vector_store %arg11[%c0_13, %c0_14], %13 {strides = array<i32>} : memref<8x256xf32, #tpu.memory_space<vmem>>, vector<8x256xf32>,
    %cst_15 = arith.constant 0xFF800000 : f32
    %15 = vector.broadcast %cst_15 : f32 to vector<1x1xf32>
    %c0_i32 = arith.constant 0 : i32
    %c128_i32 = arith.constant 128 : i32
    %16 = arith.muli %c0_i32, %c128_i32 : i32
    %17 = tpu.assume_multiple %16, 128 : i32
    %c0_16 = arith.constant 0 : index
    %18 = arith.index_cast %17 : i32 to index
    %19 = vector.load %arg9[%c0_16, %18] : memref<8x256xf32, #tpu.memory_space<vmem>>, vector<8x128xf32>
    %c0_17 = arith.constant 0 : index
    %20 = arith.index_cast %17 : i32 to index
    %21 = vector.load %arg10[%c0_17, %20] : memref<8x256xf32, #tpu.memory_space<vmem>>, vector<8x128xf32>
    %c0_18 = arith.constant 0 : index
    %c0_19 = arith.constant 0 : index
    %22 = vector.load %arg8[%c0_18, %c0_19] : memref<8x256xf32, #tpu.memory_space<vmem>>, vector<8x256xf32>
    %cst_20 = arith.constant dense<0.000000e+00> : vector<128x256xf32>
    %23 = tpu.matmul %19, %22, %cst_20 {dimension_numbers = #tpu.dot_dimension_numbers<[0], [0], [1], [1], [0, 1, 1, 1], [], []>} : vector<8x128xf32>, vector<8x256xf32>, vector<128x256xf32> -> vector<128x256xf32>
    %24 = vector.shape_cast %23 : vector<128x256xf32> to vector<1x128x256xf32>
    %cst_21 = arith.constant dense<0xFF800000> : vector<1xf32>
    %25 = vector.multi_reduction <maximumf>, %24, %cst_21 [1, 2] : vector<1x128x256xf32> to vector<1xf32>
    %26 = vector.shape_cast %25 : vector<1xf32> to vector<1x1x1xf32>
    %27 = vector.extract %26[0, 0, 0] : f32 from vector<1x1x1xf32>
    %28 = vector.broadcast %27 : f32 to vector<1x1xf32>
    %29 = arith.maximumf %15, %28 : vector<1x1xf32>
    %30 = arith.subf %15, %29 : vector<1x1xf32>
    %31 = math.exp %30 : vector<1x1xf32>
    %32 = vector.broadcast %29 : vector<1x1xf32> to vector<128x256xf32>
    %33 = arith.subf %23, %32 : vector<128x256xf32>
    %34 = math.exp %33 : vector<128x256xf32>
    %c0_22 = arith.constant 0 : index
    %c0_23 = arith.constant 0 : index
    %35 = vector.load %arg11[%c0_22, %c0_23] : memref<8x256xf32, #tpu.memory_space<vmem>>, vector<8x256xf32>
    %36 = vector.broadcast %31 : vector<1x1xf32> to vector<8x256xf32>
    %37 = arith.mulf %35, %36 : vector<8x256xf32>
    %cst_24 = arith.constant dense<0.000000e+00> : vector<8x256xf32>
    %38 = tpu.matmul %21, %34, %cst_24 {dimension_numbers = #tpu.dot_dimension_numbers<[1], [0], [0], [1], [0, 0, 1, 1], [], []>} : vector<8x128xf32>, vector<128x256xf32>, vector<8x256xf32> -> vector<8x256xf32>
    %39 = arith.addf %37, %38 : vector<8x256xf32>
    %c0_25 = arith.constant 0 : index
    %c0_26 = arith.constant 0 : index
    %40 = vector.load %arg11[%c0_25, %c0_26] : memref<8x256xf32, #tpu.memory_space<vmem>>, vector<8x256xf32>
    tpu.vector_store %arg11[%c0_25, %c0_26], %39 {strides = array<i32>} : memref<8x256xf32, #tpu.memory_space<vmem>>, vector<8x256xf32>,
    %c1_i32 = arith.constant 1 : i32
    %c128_i32_27 = arith.constant 128 : i32
    %41 = arith.muli %c1_i32, %c128_i32_27 : i32
    %42 = tpu.assume_multiple %41, 128 : i32
    %c0_28 = arith.constant 0 : index
    %43 = arith.index_cast %42 : i32 to index
    %44 = vector.load %arg9[%c0_28, %43] : memref<8x256xf32, #tpu.memory_space<vmem>>, vector<8x128xf32>
    %c0_29 = arith.constant 0 : index
    %45 = arith.index_cast %42 : i32 to index
    %46 = vector.load %arg10[%c0_29, %45] : memref<8x256xf32, #tpu.memory_space<vmem>>, vector<8x128xf32>
    %c0_30 = arith.constant 0 : index
    %c0_31 = arith.constant 0 : index
    %47 = vector.load %arg8[%c0_30, %c0_31] : memref<8x256xf32, #tpu.memory_space<vmem>>, vector<8x256xf32>
    %cst_32 = arith.constant dense<0.000000e+00> : vector<128x256xf32>
    %48 = tpu.matmul %44, %47, %cst_32 {dimension_numbers = #tpu.dot_dimension_numbers<[0], [0], [1], [1], [0, 1, 1, 1], [], []>} : vector<8x128xf32>, vector<8x256xf32>, vector<128x256xf32> -> vector<128x256xf32>
    %49 = vector.shape_cast %48 : vector<128x256xf32> to vector<1x128x256xf32>
    %cst_33 = arith.constant dense<0xFF800000> : vector<1xf32>
    %50 = vector.multi_reduction <maximumf>, %49, %cst_33 [1, 2] : vector<1x128x256xf32> to vector<1xf32>
    %51 = vector.shape_cast %50 : vector<1xf32> to vector<1x1x1xf32>
    %52 = vector.extract %51[0, 0, 0] : f32 from vector<1x1x1xf32>
    %53 = vector.broadcast %52 : f32 to vector<1x1xf32>
    %54 = arith.maximumf %29, %53 : vector<1x1xf32>
    %55 = arith.subf %29, %54 : vector<1x1xf32>
    %56 = math.exp %55 : vector<1x1xf32>
    %57 = vector.broadcast %54 : vector<1x1xf32> to vector<128x256xf32>
    %58 = arith.subf %48, %57 : vector<128x256xf32>
    %59 = math.exp %58 : vector<128x256xf32>
    %c0_34 = arith.constant 0 : index
    %c0_35 = arith.constant 0 : index
    %60 = vector.load %arg11[%c0_34, %c0_35] : memref<8x256xf32, #tpu.memory_space<vmem>>, vector<8x256xf32>
    %61 = vector.broadcast %56 : vector<1x1xf32> to vector<8x256xf32>
    %62 = arith.mulf %60, %61 : vector<8x256xf32>
    %cst_36 = arith.constant dense<0.000000e+00> : vector<8x256xf32>
    %63 = tpu.matmul %46, %59, %cst_36 {dimension_numbers = #tpu.dot_dimension_numbers<[1], [0], [0], [1], [0, 0, 1, 1], [], []>} : vector<8x128xf32>, vector<128x256xf32>, vector<8x256xf32> -> vector<8x256xf32>
    %64 = arith.addf %62, %63 : vector<8x256xf32>
    %c0_37 = arith.constant 0 : index
    %c0_38 = arith.constant 0 : index
    %65 = vector.load %arg11[%c0_37, %c0_38] : memref<8x256xf32, #tpu.memory_space<vmem>>, vector<8x256xf32>
    tpu.vector_store %arg11[%c0_37, %c0_38], %64 {strides = array<i32>} : memref<8x256xf32, #tpu.memory_space<vmem>>, vector<8x256xf32>,
    %c2_i32 = arith.constant 2 : i32
    %c2 = arith.constant 2 : index
    %c0_39 = arith.constant 0 : index
    %66 = vector.load %arg11[%c2, %c0_39] : memref<8x256xf32, #tpu.memory_space<vmem>>, vector<1x256xf32>
    %cst_40 = arith.constant dense<0.000000e+00> : vector<1xf32>
    %67 = vector.multi_reduction <add>, %66, %cst_40 [1] : vector<1x256xf32> to vector<1xf32>
    %68 = vector.shape_cast %67 : vector<1xf32> to vector<1x1xf32>
    %69 = tpu.reciprocal %68 : vector<1x1xf32> -> vector<1x1xf32>
    %c0_41 = arith.constant 0 : index
    %c0_42 = arith.constant 0 : index
    %70 = vector.load %arg11[%c0_41, %c0_42] : memref<8x256xf32, #tpu.memory_space<vmem>>, vector<8x256xf32>
    %71 = vector.broadcast %69 : vector<1x1xf32> to vector<8x256xf32>
    %72 = arith.mulf %70, %71 : vector<8x256xf32>
    %c0_43 = arith.constant 0 : index
    %c0_44 = arith.constant 0 : index
    %73 = vector.load %arg5[%c0_43, %c0_44] : memref<4x8xf32, #tpu.memory_space<vmem>>, vector<4x8xf32>
    %cst_45 = arith.constant dense<0.000000e+00> : vector<4x256xf32>
    %74 = tpu.matmul %73, %72, %cst_45 {dimension_numbers = #tpu.dot_dimension_numbers<[1], [0], [0], [1], [0, 0, 1, 1], [], []>} : vector<4x8xf32>, vector<8x256xf32>, vector<4x256xf32> -> vector<4x256xf32>
    %c0_46 = arith.constant 0 : index
    %c0_47 = arith.constant 0 : index
    %75 = vector.load %arg6[%c0_46, %c0_47] : memref<4x1xf32, #tpu.memory_space<vmem>>, vector<4x1xf32>
    %76 = vector.broadcast %75 : vector<4x1xf32> to vector<4x256xf32>
    %77 = arith.addf %74, %76 : vector<4x256xf32>
    %c0_48 = arith.constant 0 : index
    %c0_49 = arith.constant 0 : index
    %c0_50 = arith.constant 0 : index
    %78 = vector.load %arg2[%c0_48, %c0_49, %c0_50] : memref<1x4x256xf32, #tpu.memory_space<vmem>>, vector<1x4x256xf32>
    %79 = vector.shape_cast %78 : vector<1x4x256xf32> to vector<4x256xf32>
    %80 = arith.mulf %79, %77 : vector<4x256xf32>
    %c0_51 = arith.constant 0 : index
    %c0_52 = arith.constant 0 : index
    %c0_53 = arith.constant 0 : index
    %81 = vector.load %arg7[%c0_51, %c0_52, %c0_53] : memref<1x4x256xf32, #tpu.memory_space<vmem>>, vector<1x4x256xf32>
    %82 = vector.shape_cast %81 : vector<1x4x256xf32> to vector<4x256xf32>
    %83 = vector.shape_cast %80 : vector<4x256xf32> to vector<1x4x256xf32>
    tpu.vector_store %arg7[%c0_51, %c0_52, %c0_53], %83 {strides = array<i32>} : memref<1x4x256xf32, #tpu.memory_space<vmem>>, vector<1x4x256xf32>,
    return
  }
  func.func @transform_0(%arg0: i32) -> (i32, i32, i32) {
    %c0_i32 = arith.constant 0 : i32
    %c0_i32_0 = arith.constant 0 : i32
    %c0_i32_1 = arith.constant 0 : i32
    return %arg0, %c0_i32, %c0_i32_0 : i32, i32, i32
  }
  func.func @transform_1(%arg0: i32) -> (i32, i32, i32) {
    %c0_i32 = arith.constant 0 : i32
    %c0_i32_0 = arith.constant 0 : i32
    %c0_i32_1 = arith.constant 0 : i32
    return %arg0, %c0_i32, %c0_i32_0 : i32, i32, i32
  }
  func.func @transform_2(%arg0: i32) -> (i32, i32) {
    %c0_i32 = arith.constant 0 : i32
    %c0_i32_0 = arith.constant 0 : i32
    %c0_i32_1 = arith.constant 0 : i32
    return %c0_i32, %c0_i32_0 : i32, i32
  }
  func.func @transform_3(%arg0: i32) -> (i32, i32) {
    %c0_i32 = arith.constant 0 : i32
    %c0_i32_0 = arith.constant 0 : i32
    %c0_i32_1 = arith.constant 0 : i32
    return %c0_i32, %c0_i32_0 : i32, i32
  }
  func.func @transform_4(%arg0: i32) -> (i32, i32) {
    %c0_i32 = arith.constant 0 : i32
    %c0_i32_0 = arith.constant 0 : i32
    %c0_i32_1 = arith.constant 0 : i32
    return %c0_i32, %c0_i32_0 : i32, i32
  }
  func.func @transform_5(%arg0: i32) -> (i32, i32) {
    %c0_i32 = arith.constant 0 : i32
    %c0_i32_0 = arith.constant 0 : i32
    %c0_i32_1 = arith.constant 0 : i32
    return %c0_i32, %c0_i32_0 : i32, i32
  }
  func.func @transform_6(%arg0: i32) -> (i32, i32, i32) {
    %c0_i32 = arith.constant 0 : i32
    %c0_i32_0 = arith.constant 0 : i32
    %c0_i32_1 = arith.constant 0 : i32
    return %arg0, %c0_i32, %c0_i32_0 : i32, i32, i32
  }
}

</mosaic_0001>

<bundles_post_ra>
// kernel: tpu_custom_call.1
= control target key start
LH: loop header
LB: loop body
LE: loop exit
PB: predicated region body
PF: predicated region fallthrough
CT: control target
= control target key end

     0   :  { %11 = vsyncpa [#allocation7], 0  ;;  %s2500_s0 = inlined_call_operand.vmem [shape: f32[2,4,256], index: 0, kind: input, shape index: {}]   ;;  %s2501_s1 = inlined_call_operand.vmem [shape: f32[2,4,256], index: 1, kind: input, shape index: {}]   ;;  %s2502_s2 = inlined_call_operand.vmem [shape: f32[24,4], index: 2, kind: input, shape index: {}]   ;;  %s2503_s3 = inlined_call_operand.vmem [shape: f32[24,1], index: 3, kind: input, shape index: {}]   ;;  %s2504_s4 = inlined_call_operand.vmem [shape: f32[4,8], index: 4, kind: input, shape index: {}]   ;;  %s2505_s5 = inlined_call_operand.vmem [shape: f32[4,1], index: 5, kind: input, shape index: {}]   ;;  %s2506_s6 = inlined_call_operand.hbm [shape: f32[2,4,256], index: 6, kind: output, shape index: {}]  }
   0x1   :  { %13 = vsyncpa [#allocation7 + $0x1], 0  ;;  %s1937_s21 = smov 0   ;;  %s1939_s22 = smov 0  }
   0x2   :  { %s1941_s23 = smov 0   ;;  %s1943_s24 = smov 0  }
   0x3 LB: > { %s1958_s25 = sadd.s32 4294967295, %s1897_s24   ;;  %s1534_s26 = sadd.s32 4294967294, %s1897_s24   ;;  %s1897_s24 = sphi %s1943_s24, %s2512_s24   ;;  %s1893_s23 = sphi %s1941_s23, %s2511_s23   ;;  %s1889_s22 = sphi %s1939_s22, %s2510_s22   ;;  %s1885_s21 = sphi %s1937_s21, %s2509_s21  }
   0x4   : > { %s1962_s27 = sadd.s32 1, %s1897_s24   ;;  %s162_s28 = sadd.s32 1, %s1893_s23 }
   0x5   : > { %s159_s29 = ssub.s32 %s1897_s24, %s1962_s27  ;;  %p172_p0 = scmp.ne.s32.totalorder %s1893_s23, %s1889_s22 }
   0x6   : > { %p160_p1 = scmp.eq.s32.totalorder %s159_s29, 0  ;;  %p173_p2 = scmp.eq.s32.totalorder %s1958_s25, 1 }
   0x7   : > { %p178_p3 = scmp.ne.s32.totalorder %s1889_s22, %s1885_s21  ;;  %p179_p4 = scmp.eq.s32.totalorder %s1534_s26, 1 }
   0x8   : > { %s1973_s30 = scalar_select %p160_p1, %s1893_s23, %s162_s28  }
   0x9   : > { %p1975_p5 = por %p173_p2, %p172_p0  ;;  %p1979_p6 = por %p179_p4, %p178_p3 }
   0xa   : > { %p1537_p7 = scmp.ge.s32.totalorder %s1897_s24, 1  ;;  %p225_p8 = scmp.lt.s32.totalorder %s1897_s24, 3 }
   0xc   : > { %p226_p9 = pnand %p1537_p7, %p225_p8 }
   0xd   : > { %p260_p10 = scmp.lt.s32.totalorder (!%p226_p9), %s1958_s25, 1  ;;  %v1899_v0 = vmov (!%p226_p9), 0.0   ;;  %v275_v1 = vld [vmem:[%s2503_s3 + $0x8] sm:$0xff] (!%p226_p9)  ;;  %v1900_v2 = vmov (!%p226_p9), 0   ;;  %v274_v3 = vld [vmem:[%s2503_s3] sm:$0xff] (!%p226_p9)  ;;  %vm304_vm0 = vcmask (!%p226_p9), 1043456  }
   0xe   : > { %229 = sbr.rel (%p226_p9) target bundleno = 2075 (0x81b), region = 44  ;;  %373 = vmatprep.mubr.f32.mxu1 (!%p226_p9), %v1899_v0  ;;  %854 = vmatprep.mubr.f32.mxu0 (!%p226_p9), %v1899_v0  ;;  %v271_v6 = vld [vmem:[%s2502_s2] sm:$0xff] (!%p226_p9)  ;;  %vm294_vm1 = vcmask (!%p226_p9), 31744   ;;  %v276_v7 = vld [vmem:[%s2503_s3 + $0x10] sm:$0xff] (!%p226_p9)  ;;  %v272_v8 = vld [vmem:[%s2502_s2 + $0x8] sm:$0xff] (!%p226_p9)  ;;  %vm436_vm2 = vcmask (!%p226_p9), 64512  }
   0xf   : > { %1698 = vset.pattern.permute.xlu0 (!%p226_p9), %v1900_v2  ;;  %v273_v9 = vld [vmem:[%s2502_s2 + $0x10] sm:$0xff] (!%p226_p9)  ;;  %vm1345_vm3 = vcmask (!%p226_p9), 1040384   ;;  %s257_s19 = sand.u32 (!%p226_p9), 1, %s1889_s22   ;;  %s1588_s9 = sshll.u32 (!%p226_p9), %s1958_s25, 7 }
  0x10   : > { %284 = vperm.xlu0 (!%p226_p9), %1698, %v275_v1   ;;  %s1538_s20 = sshll.u32 (!%p226_p9), %s257_s19, 3  ;;  %s2458_s16 = scalar_lea.hbm (!%p226_p9), %s2506_s6, %s1588_s9 }
  0x11   : > { %s259_s10 = scalar_lea.vmem (!%p226_p9), [#allocation6], %s1538_s20 }
  0x14   : > { %279 = vperm.xlu0 (!%p226_p9), %1698, %v274_v3  }
  0x15   : > { %s1992_s11 = scalar_select %p260_p10, %s1958_s25, 1 }
  0x16   : > { %s1901_s25 = smov [#allocation6]  }
  0x17   : > { %s1586_s12 = sshll.u32 %s1992_s11, 3  ;;  %s1449_s11 = scalar_lea.sflag [#allocation7], %s257_s19 }
  0x18   : > { %s264_s17 = scalar_lea.vmem %s2500_s0, %s1586_s12  ;;  %289 = vperm.xlu0 %1698, %v276_v7   ;;  %s269_s29 = scalar_lea.vmem %s2501_s1, %s1586_s12 }
  0x19   : > { %v270_v4 = vld [vmem:[%s264_s17] sm:$0xff]  ;;  %s1839_s17 = sshll.u32 %s1901_s25, 4  ;;  %s1840_s17 = int_to_ptr.vmem [resolvable:$false] %s1839_s17 }
  0x1a   : > { %v293_v5 = vcombine.high %v270_v4, %v270_v4  ;;  %s1841_s18 = scalar_lea.vmem %s1840_s17, 256 }
  0x1c   : > { %1543 = vmatprep.subr.msk.mxu1 %vm304_vm0, %v293_v5 }
  0x1d   : > { %1544 = vmatpush1.msk.msra.mxu1 %vm304_vm0, %v270_v4 }
  0x1e   : > { %1545 = vmatmul.mubr.msk.f32.vlgmr.msra.gmra.mrb[0].mxu1 %vm294_vm1, %v271_v6 }
  0x1f   : > { %379 = vmatprep.mubr.f32.mxu1 %v1899_v0 }
  0x22   : > { %1546 = vmatmul.mubr.msk.f32.gmra.mrb[2].mxu1 %vm294_vm1, %v272_v8 }
  0x23   : > { %385 = vmatprep.mubr.f32.mxu1 %v1899_v0 }
  0x26   : > { %1547 = vmatmul.mubr.msk.f32.gmra.mrb[4].mxu1 %vm294_vm1, %v273_v9 }
  0x27   : > { %549 = vmatprep.mubr.f32.mxu1 %v1899_v0 }
  0x8f   : > { %v285_v10 = vpop.permute.xlu0 %284 }
  0x93   : > { %v280_v11 = vpop.permute.xlu0 %279 }
  0xf1   : > { %v375_v12 = vpop.f32.mrb[0].mxu1 }
  0xf2   : > { %v377_v13 = vpop.f32.mrb[1].mxu1  ;;  %v2020_v15 = vadd.f32 %v375_v12, %v280_v11 }
  0xf3   : > { %v2018_v14 = vadd.f32 %v377_v13, %v280_v11 }
  0xf5   : > { %v381_v16 = vpop.f32.mrb[2].mxu1  ;;  %485 = vmatprep.subr.mxu1 %v2018_v14 }
  0xf6   : > { %v383_v17 = vpop.f32.mrb[3].mxu1  ;;  %486 = vmatpush1.msra.mxu1 %v2020_v15  ;;  %v382_v18 = vadd.f32 %v381_v16, %v285_v10 }
  0xf7   : > { %v384_v19 = vadd.f32 %v383_v17, %v285_v10 }
  0xf8   : > { %404 = vxpose.xlu1.b32.start.end [1/1] (short) %v382_v18, 128 }
  0xf9   : > { %v2024_v20 = vpop.f32.mrb[4].mxu1  ;;  %871 = vxpose.xlu0.b32.start.end [1/1] (short) %v384_v19, 128 }
  0xfa   : > { %v2026_v21 = vpop.f32.mrb[5].mxu1 }
 0x116   : > { %1699 = vset.pattern.permute.xlu1 %v1900_v2 }
 0x178   : > { %v420_v22 = vpop.trf.xlu1 }
 0x179   : > { %1548 = vmatmul.mubr.msk.f32.vlgmr.msra.gmra.mrb[6].mxu1 %vm436_vm2, %v420_v22 }
 0x17a   : > { %555 = vmatprep.mubr.f32.mxu1 %v1899_v0 }
 0x17c   : > { %v421_v23 = vpop.trf.xlu1 }
 0x17d   : > { %1549 = vmatmul.mubr.msk.f32.gmra.mrb[8].mxu1 %vm436_vm2, %v421_v23 }
 0x17e   : > { %561 = vmatprep.mubr.f32.mxu1 %v1899_v0 }
 0x180   : > { %v422_v24 = vpop.trf.xlu1 }
 0x181   : > { %1550 = vmatmul.mubr.msk.f32.gmra.mrb[10].mxu1 %vm436_vm2, %v422_v24 }
 0x182   : > { %567 = vmatprep.mubr.f32.mxu1 %v1899_v0 }
 0x184   : > { %v423_v25 = vpop.trf.xlu1 }
 0x185   : > { %1551 = vmatmul.mubr.msk.f32.gmra.mrb[12].mxu1 %vm436_vm2, %v423_v25 }
 0x186   : > { %573 = vmatprep.mubr.f32.mxu1 %v1899_v0 }
 0x188   : > { %v424_v26 = vpop.trf.xlu1 }
 0x189   : > { %1552 = vmatmul.mubr.msk.f32.gmra.mrb[14].mxu1 %vm436_vm2, %v424_v26 }
 0x18a   : > { %579 = vmatprep.mubr.f32.mxu1 %v1899_v0 }
 0x18c   : > { %v425_v27 = vpop.trf.xlu1 }
 0x18d   : > { %1553 = vmatmul.mubr.msk.f32.gmra.mrb[16].mxu1 %vm436_vm2, %v425_v27 }
 0x18e   : > { %585 = vmatprep.mubr.f32.mxu1 %v1899_v0 }
 0x190   : > { %v426_v28 = vpop.trf.xlu1 }
 0x191   : > { %1554 = vmatmul.mubr.msk.f32.gmra.mrb[18].mxu1 %vm436_vm2, %v426_v28 }
 0x192   : > { %591 = vmatprep.mubr.f32.mxu1 %v1899_v0 }
 0x194   : > { %v427_v29 = vpop.trf.xlu1 }
 0x195   : > { %1555 = vmatmul.mubr.msk.f32.gmra.mrb[20].mxu1 %vm436_vm2, %v427_v29 }
 0x196   : > { %597 = vmatprep.mubr.f32.mxu1 %v1899_v0 }
 0x198   : > { %v428_v30 = vpop.trf.xlu1 }
 0x199   : > { %1556 = vmatmul.mubr.msk.f32.gmra.mrb[22].mxu1 %vm436_vm2, %v428_v30 }
 0x19a   : > { %603 = vmatprep.mubr.f32.mxu1 %v1899_v0 }
 0x19c   : > { %v429_v31 = vpop.trf.xlu1 }
 0x19d   : > { %1557 = vmatmul.mubr.msk.f32.gmra.mrb[24].mxu1 %vm436_vm2, %v429_v31 }
 0x19e   : > { %609 = vmatprep.mubr.f32.mxu1 %v1899_v0 }
 0x1a0   : > { %v430_v32 = vpop.trf.xlu1 }
 0x1a1   : > { %1558 = vmatmul.mubr.msk.f32.gmra.mrb[26].mxu1 %vm436_vm2, %v430_v32 }
 0x1a2   : > { %615 = vmatprep.mubr.f32.mxu1 %v1899_v0 }
 0x1a4   : > { %v431_v33 = vpop.trf.xlu1 }
 0x1a5   : > { %1559 = vmatmul.mubr.msk.f32.gmra.mrb[28].mxu1 %vm436_vm2, %v431_v33 }
 0x1a6   : > { %621 = vmatprep.mubr.f32.mxu1 %v1899_v0 }
 0x1a8   : > { %v432_v34 = vpop.trf.xlu1 }
 0x1a9   : > { %1560 = vmatmul.mubr.msk.f32.gmra.mrb[30].mxu1 %vm436_vm2, %v432_v34 }
 0x1aa   : > { %627 = vmatprep.mubr.f32.mxu1 %v1899_v0 }
 0x1ac   : > { %v433_v35 = vpop.trf.xlu1 }
 0x1ad   : > { %1561 = vmatmul.mubr.msk.f32.gmra.mrb[32].mxu1 %vm436_vm2, %v433_v35 }
 0x1ae   : > { %633 = vmatprep.mubr.f32.mxu1 %v1899_v0 }
 0x1b0   : > { %v434_v36 = vpop.trf.xlu1 }
 0x1b1   : > { %1562 = vmatmul.mubr.msk.f32.gmra.mrb[34].mxu1 %vm436_vm2, %v434_v36 }
 0x1b2   : > { %639 = vmatprep.mubr.f32.mxu1 %v1899_v0 }
 0x1b4   : > { %v435_v37 = vpop.trf.xlu1 }
 0x1b5   : > { %1563 = vmatmul.mubr.msk.f32.gmra.mrb[36].mxu1 %vm436_vm2, %v435_v37 }
 0x1b6   : > { %1321 = vmatprep.mubr.f32.mxu1 %v1899_v0 }
 0x24c   : > { %v2060_v38 = vpop.f32.mrb[6].mxu1 }
 0x24d   : > { %v2062_v39 = vpop.f32.mrb[7].mxu1 }
 0x250   : > { %v2064_v40 = vpop.f32.mrb[8].mxu1 }
 0x251   : > { %v2066_v41 = vpop.f32.mrb[9].mxu1 }
 0x254   : > { %v2068_v42 = vpop.f32.mrb[10].mxu1 }
 0x255   : > { %v646_v43 = vmax.f32 %v2060_v38, %v2068_v42  ;;  %v2072_v44 = vpop.f32.mrb[11].mxu1 }
 0x256   : > { %v647_v45 = vmax.f32 %v2062_v39, %v2072_v44 }
 0x258   : > { %v2076_v46 = vpop.f32.mrb[12].mxu1 }
 0x259   : > { %v648_v47 = vmax.f32 %v2064_v40, %v2076_v46  ;;  %v2080_v48 = vpop.f32.mrb[13].mxu1 }
 0x25a   : > { %v649_v49 = vmax.f32 %v2066_v41, %v2080_v48 }
 0x25c   : > { %v2084_v50 = vpop.f32.mrb[14].mxu1 }
 0x25d   : > { %v650_v51 = vmax.f32 %v646_v43, %v2084_v50  ;;  %v2087_v52 = vpop.f32.mrb[15].mxu1 }
 0x25e   : > { %v651_v53 = vmax.f32 %v647_v45, %v2087_v52 }
 0x260   : > { %v2090_v54 = vpop.f32.mrb[16].mxu1 }
 0x261   : > { %v652_v55 = vmax.f32 %v648_v47, %v2090_v54  ;;  %v2093_v56 = vpop.f32.mrb[17].mxu1 }
 0x262   : > { %v653_v57 = vmax.f32 %v649_v49, %v2093_v56 }
 0x264   : > { %v2096_v58 = vpop.f32.mrb[18].mxu1 }
 0x265   : > { %v654_v59 = vmax.f32 %v650_v51, %v2096_v58  ;;  %v2099_v60 = vpop.f32.mrb[19].mxu1 }
 0x266   : > { %v655_v61 = vmax.f32 %v651_v53, %v2099_v60 }
 0x268   : > { %v2102_v62 = vpop.f32.mrb[20].mxu1 }
 0x269   : > { %v656_v63 = vmax.f32 %v652_v55, %v2102_v62  ;;  %v2105_v1 = vpop.f32.mrb[21].mxu1 }
 0x26a   : > { %v657_v2 = vmax.f32 %v653_v57, %v2105_v1 }
 0x26c   : > { %v2108_v3 = vpop.f32.mrb[22].mxu1 }
 0x26d   : > { %v658_v4 = vmax.f32 %v654_v59, %v2108_v3  ;;  %v2111_v5 = vpop.f32.mrb[23].mxu1 }
 0x26e   : > { %v659_v6 = vmax.f32 %v655_v61, %v2111_v5 }
 0x270   : > { %v2114_v7 = vpop.f32.mrb[24].mxu1 }
 0x271   : > { %v660_v8 = vmax.f32 %v656_v63, %v2114_v7  ;;  %v2117_v9 = vpop.f32.mrb[25].mxu1 }
 0x272   : > { %v661_v10 = vmax.f32 %v657_v2, %v2117_v9 }
 0x274   : > { %v2120_v11 = vpop.f32.mrb[26].mxu1 }
 0x275   : > { %v662_v12 = vmax.f32 %v658_v4, %v2120_v11  ;;  %v2123_v13 = vpop.f32.mrb[27].mxu1 }
 0x276   : > { %v663_v16 = vmax.f32 %v659_v6, %v2123_v13 }
 0x278   : > { %v2126_v17 = vpop.f32.mrb[28].mxu1 }
 0x279   : > { %v664_v18 = vmax.f32 %v660_v8, %v2126_v17  ;;  %v2129_v19 = vpop.f32.mrb[29].mxu1 }
 0x27a   : > { %v665_v22 = vmax.f32 %v661_v10, %v2129_v19 }
 0x27c   : > { %v2132_v23 = vpop.f32.mrb[30].mxu1 }
 0x27d   : > { %v666_v24 = vmax.f32 %v662_v12, %v2132_v23  ;;  %v2135_v25 = vpop.f32.mrb[31].mxu1 }
 0x27e   : > { %v667_v26 = vmax.f32 %v663_v16, %v2135_v25 }
 0x280   : > { %v2138_v27 = vpop.f32.mrb[32].mxu1 }
 0x281   : > { %v668_v28 = vmax.f32 %v664_v18, %v2138_v27  ;;  %v2141_v29 = vpop.f32.mrb[33].mxu1 }
 0x282   : > { %v669_v30 = vmax.f32 %v665_v22, %v2141_v29 }
 0x284   : > { %v2144_v31 = vpop.f32.mrb[34].mxu1 }
 0x285   : > { %v670_v32 = vmax.f32 %v666_v24, %v2144_v31  ;;  %v2147_v33 = vpop.f32.mrb[35].mxu1 }
 0x286   : > { %v671_v34 = vmax.f32 %v667_v26, %v2147_v33 }
 0x288   : > { %v2150_v35 = vpop.f32.mrb[36].mxu1  ;;  %v674_v36 = vmax.f32 %v670_v32, %v671_v34 }
 0x289   : > { %v672_v37 = vmax.f32 %v668_v28, %v2150_v35  ;;  %v2153_v43 = vpop.f32.mrb[37].mxu1 }
 0x28a   : > { %v673_v45 = vmax.f32 %v669_v30, %v2153_v43 }
 0x28c   : > { %v675_v47 = vmax.f32 %v672_v37, %v673_v45 }
 0x28e   : > { %v676_v49 = vmax.f32 %v674_v36, %v675_v47 }
 0x290   : > { %677 = vmax.xlane.f32.xlu1 %v676_v49 }
 0x31d   : > { %v678_v51 = vpop.xlane.xlu1 %677 }
 0x31e   : > { %v679_v53 = vrot.slane %v678_v51, 4 }
 0x320   : > { %v680_v55 = vmax.f32 %v678_v51, %v679_v53 }
 0x322   : > { %v681_v57 = vrot.slane %v680_v55, 2 }
 0x324   : > { %v682_v59 = vmax.f32 %v680_v55, %v681_v57 }
 0x326   : > { %v683_v61 = vrot.slane %v682_v59, 1 }
 0x328   : > { %v684_v63 = vmax.f32 %v682_v59, %v683_v61 }
 0x32a   : > { %1653 = vpush %v684_v63 }
 0x35b   : > { %s1654_s13 = spop %1653 }
 0x35c   : > { %v2156_v2 = vstv %s1654_s13  ;;  %s1463_s13 = sshll.u32 %s259_s10, 4  ;;  %s2460_s13 = int_to_ptr.vmem [resolvable:$true] %s1463_s13 }
 0x35d   : > { %v690_v4 = vsub.f32 %v2060_v38, %v2156_v2  ;;  %v691_v6 = vsub.f32 %v2062_v39, %v2156_v2  ;;  %v692_v8 = vsub.f32 %v2064_v40, %v2156_v2  ;;  %v693_v10 = vsub.f32 %v2066_v41, %v2156_v2  ;;  %s1835_s12 = scalar_lea.vmem %s2460_s13, 128  ;;  %p1842_p0 = scmp.lt.s32.totalorder %s2460_s13, %s1840_s17 }
 0x35e   : > { %v694_v12 = vsub.f32 %v2068_v42, %v2156_v2  ;;  %v695_v16 = vsub.f32 %v2072_v44, %v2156_v2  ;;  %v696_v18 = vsub.f32 %v2076_v46, %v2156_v2  ;;  %v697_v39 = vsub.f32 %v2080_v48, %v2156_v2  ;;  %p1836_p11 = scmp.ne.s32.totalorder %s2460_s13, %s1835_s12  ;;  %p1843_p1 = scmp.lt.s32.totalorder %s1841_s18, %s1835_s12 }
 0x35f   : > { %v722_v22 = vmul.f32 1.442695, %v690_v4  ;;  %v724_v38 = vmul.f32 1.442695, %v691_v6  ;;  %v726_v24 = vmul.f32 1.442695, %v692_v8  ;;  %v698_v40 = vsub.f32 %v2084_v50, %v2156_v2 }
 0x360   : > { %v728_v26 = vmul.f32 1.442695, %v693_v10  ;;  %v730_v41 = vmul.f32 1.442695, %v694_v12  ;;  %v699_v42 = vsub.f32 %v2087_v52, %v2156_v2  ;;  %v732_v44 = vmul.f32 1.442695, %v695_v16  ;;  %v2204_v12 = vpop.permute.xlu0 %289  ;;  %p1837_p12 = pnand %p1836_p11, %p1975_p5  ;;  %p1844_p2 = por %p1843_p1, %p1842_p0 }
 0x361   : > { %1701 = vpow2.f32 %v722_v22  ;;  %v700_v46 = vsub.f32 %v2090_v54, %v2156_v2  ;;  %v734_v28 = vmul.f32 1.442695, %v696_v18  ;;  %v701_v30 = vsub.f32 %v2093_v56, %v2156_v2 }
 0x362   : > { %1703 = vpow2.f32 %v724_v38  ;;  %v736_v48 = vmul.f32 1.442695, %v697_v39  ;;  %v702_v50 = vsub.f32 %v2096_v58, %v2156_v2  ;;  %v738_v32 = vmul.f32 1.442695, %v698_v40  ;;  %p1838_p13 = pneg %p1837_p12 }
 0x363   : > { %1705 = vpow2.f32 %v726_v24  ;;  %v703_v52 = vsub.f32 %v2099_v60, %v2156_v2  ;;  %v740_v34 = vmul.f32 1.442695, %v699_v42  ;;  %v704_v54 = vsub.f32 %v2102_v62, %v2156_v2 }
 0x364   : > { %1707 = vpow2.f32 %v728_v26  ;;  %v742_v36 = vmul.f32 1.442695, %v700_v46  ;;  %v705_v56 = vsub.f32 %v2105_v1, %v2156_v2  ;;  %v744_v37 = vmul.f32 1.442695, %v701_v30  ;;  %v2216_v46 = vpop.trf.xlu0  ;;  %p1845_p3 = pnand %p1844_p2, %p1838_p13 }
 0x365   : > { %1709 = vpow2.f32 %v730_v41  ;;  %v706_v58 = vsub.f32 %v2108_v3, %v2156_v2  ;;  %v746_v45 = vmul.f32 1.442695, %v702_v50  ;;  %v707_v60 = vsub.f32 %v2111_v5, %v2156_v2 }
 0x366   : > { %1711 = vpow2.f32 %v732_v44  ;;  %v748_v47 = vmul.f32 1.442695, %v703_v52  ;;  %v708_v62 = vsub.f32 %v2114_v7, %v2156_v2  ;;  %v750_v51 = vmul.f32 1.442695, %v704_v54 }
 0x367   : > { %1713 = vpow2.f32 %v734_v28  ;;  %v709_v1 = vsub.f32 %v2117_v9, %v2156_v2  ;;  %v752_v55 = vmul.f32 1.442695, %v705_v56  ;;  %v710_v57 = vsub.f32 %v2120_v11, %v2156_v2 }
 0x368   : > { %1715 = vpow2.f32 %v736_v48  ;;  %v754_v5 = vmul.f32 1.442695, %v706_v58  ;;  %v711_v61 = vsub.f32 %v2123_v13, %v2156_v2  ;;  %v756_v7 = vmul.f32 1.442695, %v707_v60 }
 0x369   : > { %1717 = vpow2.f32 %v738_v32  ;;  %v712_v6 = vsub.f32 %v2126_v17, %v2156_v2  ;;  %v758_v9 = vmul.f32 1.442695, %v708_v62  ;;  %v713_v11 = vsub.f32 %v2129_v19, %v2156_v2 }
 0x36a   : > { %1719 = vpow2.f32 %v740_v34  ;;  %v760_v16 = vmul.f32 1.442695, %v709_v1  ;;  %v714_v13 = vsub.f32 %v2132_v23, %v2156_v2  ;;  %v762_v22 = vmul.f32 1.442695, %v710_v57 }
 0x36b   : > { %v1702_v49 = vpop.eup %1701  ;;  %1721 = vpow2.f32 %v742_v36  ;;  %v715_v17 = vsub.f32 %v2135_v25, %v2156_v2  ;;  %v764_v24 = vmul.f32 1.442695, %v711_v61  ;;  %v716_v19 = vsub.f32 %v2138_v27, %v2156_v2 }
 0x36c   : > { %v1704_v53 = vpop.eup %1703  ;;  %1723 = vpow2.f32 %v744_v37  ;;  %v766_v40 = vmul.f32 1.442695, %v712_v6  ;;  %v717_v23 = vsub.f32 %v2141_v29, %v2156_v2  ;;  %v768_v44 = vmul.f32 1.442695, %v713_v11 }
 0x36d   : > { %v1706_v3 = vpop.eup %1705  ;;  %1725 = vpow2.f32 %v746_v45  ;;  %v718_v28 = vsub.f32 %v2144_v31, %v2156_v2  ;;  %v770_v30 = vmul.f32 1.442695, %v714_v13  ;;  %v719_v27 = vsub.f32 %v2147_v33, %v2156_v2 }
 0x36e   : > { %v1708_v59 = vpop.eup %1707  ;;  %1727 = vpow2.f32 %v748_v47  ;;  %v1591_v63 = vpack.c.bf16 %v1706_v3, %v1702_v49  ;;  %v772_v50 = vmul.f32 1.442695, %v715_v17  ;;  %v720_v52 = vsub.f32 %v2150_v35, %v2156_v2  ;;  %v888_v47 = vpop.trf.xlu0 }
 0x36f   : > { %v1710_v4 = vpop.eup %1709  ;;  %1729 = vpow2.f32 %v750_v51  ;;  %v1589_v8 = vpack.c.bf16 %v1708_v59, %v1704_v53  ;;  %v774_v34 = vmul.f32 1.442695, %v716_v19  ;;  %v721_v31 = vsub.f32 %v2153_v43, %v2156_v2 }
 0x370   : > { %v1712_v10 = vpop.eup %1711  ;;  %1731 = vpow2.f32 %v752_v55  ;;  %v776_v56 = vmul.f32 1.442695, %v717_v23  ;;  %v778_v33 = vmul.f32 1.442695, %v718_v28  ;;  %v780_v45 = vmul.f32 1.442695, %v719_v27 }
 0x371   : > { %v1714_v18 = vpop.eup %1713  ;;  %1733 = vpow2.f32 %v754_v5  ;;  %1590 = vmatprep.subr.bf16.mxu0 %v1589_v8  ;;  %v782_v49 = vmul.f32 1.442695, %v720_v52  ;;  %v784_v53 = vmul.f32 1.442695, %v721_v31  ;;  %v388_v19 = vadd.f32 %v2024_v20, %v2204_v12 }
 0x372   : > { %v1716_v38 = vpop.eup %1715  ;;  %1735 = vpow2.f32 %v756_v7  ;;  %1592 = vmatpush1.bf16.msra.mxu0 %v1591_v63  ;;  %v1595_v39 = vpack.c.bf16 %v1714_v18, %v1710_v4  ;;  %v889_v59 = vpop.trf.xlu0 }
 0x373   : > { %v1718_v26 = vpop.eup %1717  ;;  %1737 = vpow2.f32 %v758_v9  ;;  %v1593_v41 = vpack.c.bf16 %v1716_v38, %v1712_v10 }
 0x374   : > { %v1720_v42 = vpop.eup %1719  ;;  %1739 = vpow2.f32 %v760_v16 }
 0x375   : > { %v1722_v25 = vpop.eup %1721  ;;  %1741 = vpow2.f32 %v762_v22  ;;  %1594 = vmatprep.subr.bf16.mxu0 %v1593_v41 }
 0x376   : > { %v1724_v48 = vpop.eup %1723  ;;  %1743 = vpow2.f32 %v764_v24  ;;  %1596 = vmatpush1.bf16.msra.mxu0 %v1595_v39  ;;  %v1599_v32 = vpack.c.bf16 %v1722_v25, %v1718_v26  ;;  %v890_v16 = vpop.trf.xlu0 }
 0x377   : > { %v1726_v29 = vpop.eup %1725  ;;  %1745 = vpow2.f32 %v766_v40  ;;  %v1597_v54 = vpack.c.bf16 %v1724_v48, %v1720_v42 }
 0x378   : > { %v1728_v36 = vpop.eup %1727  ;;  %1747 = vpow2.f32 %v768_v44 }
 0x379   : > { %v1730_v37 = vpop.eup %1729  ;;  %1749 = vpow2.f32 %v770_v30  ;;  %1598 = vmatprep.subr.bf16.mxu0 %v1597_v54 }
 0x37a   : > { %v1732_v58 = vpop.eup %1731  ;;  %1751 = vpow2.f32 %v772_v50  ;;  %1600 = vmatpush1.bf16.msra.mxu0 %v1599_v32  ;;  %v1603_v60 = vpack.c.bf16 %v1730_v37, %v1726_v29  ;;  %v891_v26 = vpop.trf.xlu0 }
 0x37b   : > { %v1734_v35 = vpop.eup %1733  ;;  %1753 = vpow2.f32 %v774_v34  ;;  %v1601_v62 = vpack.c.bf16 %v1732_v58, %v1728_v36 }
 0x37c   : > { %v1736_v51 = vpop.eup %1735  ;;  %1755 = vpow2.f32 %v776_v56 }
 0x37d   : > { %v1738_v43 = vpop.eup %1737  ;;  %1757 = vpow2.f32 %v778_v33  ;;  %1602 = vmatprep.subr.bf16.mxu0 %v1601_v62 }
 0x37e   : > { %v1740_v1 = vpop.eup %1739  ;;  %1759 = vpow2.f32 %v780_v45  ;;  %1604 = vmatpush1.bf16.msra.mxu0 %v1603_v60  ;;  %v1607_v55 = vpack.c.bf16 %v1738_v43, %v1734_v35  ;;  %v892_v40 = vpop.trf.xlu0 }
 0x37f   : > { %v1742_v3 = vpop.eup %1741  ;;  %1761 = vpow2.f32 %v782_v49  ;;  %v1605_v57 = vpack.c.bf16 %v1740_v1, %v1736_v51 }
 0x380   : > { %v1744_v5 = vpop.eup %1743  ;;  %1763 = vpow2.f32 %v784_v53 }
 0x381   : > { %v1746_v61 = vpop.eup %1745  ;;  %1606 = vmatprep.subr.bf16.mxu0 %v1605_v57 }
 0x382   : > { %v1748_v7 = vpop.eup %1747  ;;  %1608 = vmatpush1.bf16.msra.mxu0 %v1607_v55  ;;  %v1611_v63 = vpack.c.bf16 %v1746_v61, %v1742_v3  ;;  %v893_v41 = vpop.trf.xlu0 }
 0x383   : > { %v1750_v4 = vpop.eup %1749  ;;  %v1609_v6 = vpack.c.bf16 %v1748_v7, %v1744_v5 }
 0x384   : > { %v1752_v9 = vpop.eup %1751 }
 0x385   : > { %v1754_v8 = vpop.eup %1753  ;;  %1610 = vmatprep.subr.bf16.mxu0 %v1609_v6 }
 0x386   : > { %v1756_v10 = vpop.eup %1755  ;;  %1612 = vmatpush1.bf16.msra.mxu0 %v1611_v63  ;;  %v1615_v11 = vpack.c.bf16 %v1754_v8, %v1750_v4 }
 0x387   : > { %v1758_v18 = vpop.eup %1757  ;;  %v1613_v13 = vpack.c.bf16 %v1756_v10, %v1752_v9 }
 0x388   : > { %v1760_v22 = vpop.eup %1759 }
 0x389   : > { %v1762_v38 = vpop.eup %1761  ;;  %1614 = vmatprep.subr.bf16.mxu0 %v1613_v13 }
 0x38a   : > { %v1764_v17 = vpop.eup %1763  ;;  %1616 = vmatpush1.bf16.msra.mxu0 %v1615_v11  ;;  %v1619_v24 = vpack.c.bf16 %v1762_v38, %v1758_v18 }
 0x38b   : > { %v1617_v39 = vpack.c.bf16 %v1764_v17, %v1760_v22 }
 0x38d   : > { %1618 = vmatprep.subr.bf16.mxu0 %v1617_v39 }
 0x38e   : > { %1620 = vmatpush1.bf16.msra.mxu0 %v1619_v24 }
 0x38f   : > { %951 = vmatprep.subr.mxu0 %v2018_v14  ;;  %v894_v14 = vpop.trf.xlu0 }
 0x391   : > { %855 = vmatmul.mubr.f32.vlgmr.msra.gmra.mrb[0].mxu0 %v388_v19 }
 0x392   : > { %952 = vmatpush1.msra.mxu0 %v2020_v15  ;;  %1015 = vmatprep.mubr.f32.mxu0 %v1899_v0 }
 0x393   : > { %v895_v15 = vpop.trf.xlu0 }
 0x395   : > { %1564 = vmatmul.mubr.msk.f32.vlgmr.msra.gmra.mrb[2].mxu0 %vm436_vm2, %v2216_v46 }
 0x396   : > { %1021 = vmatprep.mubr.f32.mxu0 %v1899_v0 }
 0x397   : > { %v896_v20 = vpop.trf.xlu0 }
 0x399   : > { %1565 = vmatmul.mubr.msk.f32.gmra.mrb[4].mxu0 %vm436_vm2, %v888_v47 }
 0x39a   : > { %1027 = vmatprep.mubr.f32.mxu0 %v1899_v0 }
 0x39b   : > { %v897_v42 = vpop.trf.xlu0 }
 0x39d   : > { %1566 = vmatmul.mubr.msk.f32.gmra.mrb[6].mxu0 %vm436_vm2, %v889_v59 }
 0x39e   : > { %1033 = vmatprep.mubr.f32.mxu0 %v1899_v0 }
 0x39f   : > { %v898_v23 = vpop.trf.xlu0 }
 0x3a1   : > { %1567 = vmatmul.mubr.msk.f32.gmra.mrb[8].mxu0 %vm436_vm2, %v890_v16 }
 0x3a2   : > { %1039 = vmatprep.mubr.f32.mxu0 %v1899_v0 }
 0x3a3   : > { %v899_v44 = vpop.trf.xlu0 }
 0x3a5   : > { %1568 = vmatmul.mubr.msk.f32.gmra.mrb[10].mxu0 %vm436_vm2, %v891_v26 }
 0x3a6   : > { %1045 = vmatprep.mubr.f32.mxu0 %v1899_v0 }
 0x3a7   : > { %v900_v46 = vpop.trf.xlu0 }
 0x3a9   : > { %1569 = vmatmul.mubr.msk.f32.gmra.mrb[12].mxu0 %vm436_vm2, %v892_v40 }
 0x3aa   : > { %1051 = vmatprep.mubr.f32.mxu0 %v1899_v0 }
 0x3ab   : > { %v901_v25 = vpop.trf.xlu0 }
 0x3ad   : > { %1570 = vmatmul.mubr.msk.f32.gmra.mrb[14].mxu0 %vm436_vm2, %v893_v41 }
 0x3ae   : > { %1057 = vmatprep.mubr.f32.mxu0 %v1899_v0 }
 0x3af   : > { %v902_v28 = vpop.trf.xlu0 }
 0x3b1   : > { %1571 = vmatmul.mubr.msk.f32.gmra.mrb[16].mxu0 %vm436_vm2, %v894_v14 }
 0x3b2   : > { %1063 = vmatprep.mubr.f32.mxu0 %v1899_v0 }
 0x3b5   : > { %1572 = vmatmul.mubr.msk.f32.gmra.mrb[18].mxu0 %vm436_vm2, %v895_v15 }
 0x3b6   : > { %1069 = vmatprep.mubr.f32.mxu0 %v1899_v0 }
 0x3b9   : > { %1573 = vmatmul.mubr.msk.f32.gmra.mrb[20].mxu0 %vm436_vm2, %v896_v20 }
 0x3ba   : > { %1075 = vmatprep.mubr.f32.mxu0 %v1899_v0 }
 0x3bd   : > { %1574 = vmatmul.mubr.msk.f32.gmra.mrb[22].mxu0 %vm436_vm2, %v897_v42 }
 0x3be   : > { %1081 = vmatprep.mubr.f32.mxu0 %v1899_v0 }
 0x3c1   : > { %1575 = vmatmul.mubr.msk.f32.gmra.mrb[24].mxu0 %vm436_vm2, %v898_v23 }
 0x3c2   : > { %1087 = vmatprep.mubr.f32.mxu0 %v1899_v0 }
 0x3c5   : > { %1576 = vmatmul.mubr.msk.f32.gmra.mrb[26].mxu0 %vm436_vm2, %v899_v44 }
 0x3c6   : > { %1093 = vmatprep.mubr.f32.mxu0 %v1899_v0 }
 0x3c9   : > { %1577 = vmatmul.mubr.msk.f32.gmra.mrb[28].mxu0 %vm436_vm2, %v900_v46 }
 0x3ca   : > { %1099 = vmatprep.mubr.f32.mxu0 %v1899_v0 }
 0x3cd   : > { %1578 = vmatmul.mubr.msk.f32.gmra.mrb[30].mxu0 %vm436_vm2, %v901_v25 }
 0x3ce   : > { %1105 = vmatprep.mubr.f32.mxu0 %v1899_v0 }
 0x3d1   : > { %1579 = vmatmul.mubr.msk.f32.gmra.mrb[32].mxu0 %vm436_vm2, %v902_v28 }
 0x464   : > { %v2263_v30 = vpop.f32.mrb[0].mxu0 }
 0x465   : > { %v2265_v48 = vpop.f32.mrb[1].mxu0 }
 0x468   : > { %v2267_v27 = vpop.f32.mrb[2].mxu0 }
 0x469   : > { %v2269_v50 = vpop.f32.mrb[3].mxu0 }
 0x46c   : > { %v2271_v32 = vpop.f32.mrb[4].mxu0 }
 0x46d   : > { %v2273_v29 = vpop.f32.mrb[5].mxu0 }
 0x470   : > { %v2275_v52 = vpop.f32.mrb[6].mxu0 }
 0x471   : > { %v1112_v34 = vmax.f32 %v2267_v27, %v2275_v52  ;;  %v2279_v54 = vpop.f32.mrb[7].mxu0 }
 0x472   : > { %v1113_v36 = vmax.f32 %v2269_v50, %v2279_v54 }
 0x474   : > { %v2283_v31 = vpop.f32.mrb[8].mxu0 }
 0x475   : > { %v1114_v56 = vmax.f32 %v2271_v32, %v2283_v31  ;;  %v2287_v37 = vpop.f32.mrb[9].mxu0 }
 0x476   : > { %v1115_v33 = vmax.f32 %v2273_v29, %v2287_v37 }
 0x478   : > { %v2291_v58 = vpop.f32.mrb[10].mxu0 }
 0x479   : > { %v1116_v45 = vmax.f32 %v1112_v34, %v2291_v58  ;;  %v2294_v60 = vpop.f32.mrb[11].mxu0 }
 0x47a   : > { %v1117_v47 = vmax.f32 %v1113_v36, %v2294_v60 }
 0x47c   : > { %v2297_v35 = vpop.f32.mrb[12].mxu0 }
 0x47d   : > { %v1118_v49 = vmax.f32 %v1114_v56, %v2297_v35  ;;  %v2300_v62 = vpop.f32.mrb[13].mxu0 }
 0x47e   : > { %v1119_v51 = vmax.f32 %v1115_v33, %v2300_v62 }
 0x480   : > { %v2303_v53 = vpop.f32.mrb[14].mxu0 }
 0x481   : > { %v1120_v43 = vmax.f32 %v1116_v45, %v2303_v53  ;;  %v2306_v1 = vpop.f32.mrb[15].mxu0 }
 0x482   : > { %v1121_v55 = vmax.f32 %v1117_v47, %v2306_v1 }
 0x484   : > { %v2309_v3 = vpop.f32.mrb[16].mxu0 }
 0x485   : > { %v1122_v57 = vmax.f32 %v1118_v49, %v2309_v3  ;;  %v2312_v5 = vpop.f32.mrb[17].mxu0 }
 0x486   : > { %v1123_v59 = vmax.f32 %v1119_v51, %v2312_v5 }
 0x488   : > { %v2315_v61 = vpop.f32.mrb[18].mxu0 }
 0x489   : > { %v1124_v7 = vmax.f32 %v1120_v43, %v2315_v61  ;;  %v2318_v63 = vpop.f32.mrb[19].mxu0 }
 0x48a   : > { %v1125_v4 = vmax.f32 %v1121_v55, %v2318_v63 }
 0x48c   : > { %v2321_v6 = vpop.f32.mrb[20].mxu0 }
 0x48d   : > { %v1126_v9 = vmax.f32 %v1122_v57, %v2321_v6  ;;  %v2324_v8 = vpop.f32.mrb[21].mxu0 }
 0x48e   : > { %v1127_v10 = vmax.f32 %v1123_v59, %v2324_v8 }
 0x490   : > { %v2327_v11 = vpop.f32.mrb[22].mxu0 }
 0x491   : > { %v1128_v16 = vmax.f32 %v1124_v7, %v2327_v11  ;;  %v2330_v18 = vpop.f32.mrb[23].mxu0 }
 0x492   : > { %v1129_v13 = vmax.f32 %v1125_v4, %v2330_v18 }
 0x494   : > { %v2333_v22 = vpop.f32.mrb[24].mxu0 }
 0x495   : > { %v1130_v38 = vmax.f32 %v1126_v9, %v2333_v22  ;;  %v2336_v17 = vpop.f32.mrb[25].mxu0  ;;  %v687_v9 = vsub.f32 -inf, %v2156_v2 }
 0x496   : > { %v1131_v24 = vmax.f32 %v1127_v10, %v2336_v17 }
 0x498   : > { %v2339_v39 = vpop.f32.mrb[26].mxu0 }
 0x499   : > { %v1132_v26 = vmax.f32 %v1128_v16, %v2339_v39  ;;  %v2342_v19 = vpop.f32.mrb[27].mxu0 }
 0x49a   : > { %v1133_v40 = vmax.f32 %v1129_v13, %v2342_v19 }
 0x49c   : > { %v2345_v41 = vpop.f32.mrb[28].mxu0 }
 0x49d   : > { %v1134_v14 = vmax.f32 %v1130_v38, %v2345_v41  ;;  %v2348_v15 = vpop.f32.mrb[29].mxu0  ;;  %v688_v38 = vmul.f32 1.442695, %v687_v9 }
 0x49e   : > { %v1135_v20 = vmax.f32 %v1131_v24, %v2348_v15 }
 0x49f   : > { %1765 = vpow2.f32 %v688_v38 }
 0x4a0   : > { %v2351_v42 = vpop.f32.mrb[30].mxu0 }
 0x4a1   : > { %v1136_v23 = vmax.f32 %v1132_v26, %v2351_v42  ;;  %v2354_v44 = vpop.f32.mrb[31].mxu0 }
 0x4a2   : > { %v1137_v46 = vmax.f32 %v1133_v40, %v2354_v44 }
 0x4a4   : > { %v2357_v25 = vpop.f32.mrb[32].mxu0  ;;  %v1140_v28 = vmax.f32 %v1136_v23, %v1137_v46 }
 0x4a5   : > { %v1138_v34 = vmax.f32 %v1134_v14, %v2357_v25  ;;  %v2360_v36 = vpop.f32.mrb[33].mxu0 }
 0x4a6   : > { %v1139_v56 = vmax.f32 %v1135_v20, %v2360_v36 }
 0x4a8   : > { %v1141_v33 = vmax.f32 %v1138_v34, %v1139_v56 }
 0x4aa   : > { %v1142_v45 = vmax.f32 %v1140_v28, %v1141_v33 }
 0x4ac   : > { %1143 = vmax.xlane.f32.xlu0 %v1142_v45 }
 0x539   : > { %v1144_v47 = vpop.xlane.xlu0 %1143 }
 0x53a   : > { %v1145_v49 = vrot.slane %v1144_v47, 4 }
 0x53c   : > { %v1146_v51 = vmax.f32 %v1144_v47, %v1145_v49 }
 0x53e   : > { %v1147_v43 = vrot.slane %v1146_v51, 2 }
 0x540   : > { %v1148_v55 = vmax.f32 %v1146_v51, %v1147_v43  ;;  %v2401_v51 = vpop.eup %1765 }
 0x542   : > { %v1149_v57 = vrot.slane %v1148_v55, 1 }
 0x544   : > { %v1150_v59 = vmax.f32 %v1148_v55, %v1149_v57 }
 0x546   : > { %1655 = vpush %v1150_v59 }
 0x577   : > { %s1656_s14 = spop %1655 }
 0x578   : > { %v1152_v7 = vstv %s1656_s14 }
 0x579   : > { %v2364_v4 = vmax.f32 %v2156_v2, %v1152_v7 }
 0x57b   : > { %v1157_v10 = vsub.f32 %v2267_v27, %v2364_v4  ;;  %v1158_v16 = vsub.f32 %v2269_v50, %v2364_v4  ;;  %v1159_v13 = vsub.f32 %v2271_v32, %v2364_v4  ;;  %v1160_v24 = vsub.f32 %v2273_v29, %v2364_v4 }
 0x57c   : > { %v1161_v26 = vsub.f32 %v2275_v52, %v2364_v4  ;;  %v1162_v40 = vsub.f32 %v2279_v54, %v2364_v4  ;;  %v1163_v14 = vsub.f32 %v2283_v31, %v2364_v4  ;;  %v1164_v50 = vsub.f32 %v2287_v37, %v2364_v4 }
 0x57d   : > { %v1189_v27 = vmul.f32 1.442695, %v1157_v10  ;;  %v1191_v20 = vmul.f32 1.442695, %v1158_v16  ;;  %v1193_v23 = vmul.f32 1.442695, %v1159_v13  ;;  %v1165_v29 = vsub.f32 %v2291_v58, %v2364_v4 }
 0x57e   : > { %v1195_v32 = vmul.f32 1.442695, %v1160_v24  ;;  %v1197_v46 = vmul.f32 1.442695, %v1161_v26  ;;  %v1166_v52 = vsub.f32 %v2294_v60, %v2364_v4  ;;  %v1199_v54 = vmul.f32 1.442695, %v1162_v40 }
 0x57f   : > { %1767 = vpow2.f32 %v1189_v27  ;;  %v1167_v31 = vsub.f32 %v2297_v35, %v2364_v4  ;;  %v1201_v28 = vmul.f32 1.442695, %v1163_v14  ;;  %v1168_v34 = vsub.f32 %v2300_v62, %v2364_v4 }
 0x580   : > { %1769 = vpow2.f32 %v1191_v20  ;;  %v1203_v37 = vmul.f32 1.442695, %v1164_v50  ;;  %v1169_v58 = vsub.f32 %v2303_v53, %v2364_v4  ;;  %v1205_v56 = vmul.f32 1.442695, %v1165_v29 }
 0x581   : > { %1771 = vpow2.f32 %v1193_v23  ;;  %v1170_v60 = vsub.f32 %v2306_v1, %v2364_v4  ;;  %v1207_v33 = vmul.f32 1.442695, %v1166_v52  ;;  %v1171_v35 = vsub.f32 %v2309_v3, %v2364_v4 }
 0x582   : > { %1773 = vpow2.f32 %v1195_v32  ;;  %v1209_v45 = vmul.f32 1.442695, %v1167_v31  ;;  %v1172_v62 = vsub.f32 %v2312_v5, %v2364_v4  ;;  %v1211_v47 = vmul.f32 1.442695, %v1168_v34 }
 0x583   : > { %1775 = vpow2.f32 %v1197_v46  ;;  %v1173_v53 = vsub.f32 %v2315_v61, %v2364_v4  ;;  %v1213_v49 = vmul.f32 1.442695, %v1169_v58  ;;  %v1174_v1 = vsub.f32 %v2318_v63, %v2364_v4 }
 0x584   : > { %1777 = vpow2.f32 %v1199_v54  ;;  %v1215_v43 = vmul.f32 1.442695, %v1170_v60  ;;  %v1175_v55 = vsub.f32 %v2321_v6, %v2364_v4  ;;  %v1217_v5 = vmul.f32 1.442695, %v1171_v35 }
 0x585   : > { %1779 = vpow2.f32 %v1201_v28  ;;  %v1176_v59 = vsub.f32 %v2324_v8, %v2364_v4  ;;  %v1219_v61 = vmul.f32 1.442695, %v1172_v62  ;;  %v1177_v9 = vsub.f32 %v2327_v11, %v2364_v4 }
 0x586   : > { %1781 = vpow2.f32 %v1203_v37  ;;  %v1221_v63 = vmul.f32 1.442695, %v1173_v53  ;;  %v1178_v16 = vsub.f32 %v2330_v18, %v2364_v4  ;;  %v1223_v6 = vmul.f32 1.442695, %v1174_v1 }
 0x587   : > { %1783 = vpow2.f32 %v1205_v56  ;;  %v1179_v24 = vsub.f32 %v2333_v22, %v2364_v4  ;;  %v1225_v8 = vmul.f32 1.442695, %v1175_v55  ;;  %v1180_v11 = vsub.f32 %v2336_v17, %v2364_v4 }
 0x588   : > { %1785 = vpow2.f32 %v1207_v33  ;;  %v1227_v14 = vmul.f32 1.442695, %v1176_v59  ;;  %v1181_v18 = vsub.f32 %v2339_v39, %v2364_v4  ;;  %v1229_v20 = vmul.f32 1.442695, %v1177_v9 }
 0x589   : > { %v1768_v3 = vpop.eup %1767  ;;  %1787 = vpow2.f32 %v1209_v45  ;;  %v1182_v22 = vsub.f32 %v2342_v19, %v2364_v4  ;;  %v1231_v50 = vmul.f32 1.442695, %v1178_v16  ;;  %v1183_v17 = vsub.f32 %v2345_v41, %v2364_v4 }
 0x58a   : > { %v1770_v57 = vpop.eup %1769  ;;  %1789 = vpow2.f32 %v1211_v47  ;;  %v1233_v46 = vmul.f32 1.442695, %v1179_v24  ;;  %v1184_v39 = vsub.f32 %v2348_v15, %v2364_v4  ;;  %v1235_v31 = vmul.f32 1.442695, %v1180_v11 }
 0x58b   : > { %v1772_v7 = vpop.eup %1771  ;;  %1791 = vpow2.f32 %v1213_v49  ;;  %v1185_v19 = vsub.f32 %v2351_v42, %v2364_v4  ;;  %v1237_v34 = vmul.f32 1.442695, %v1181_v18  ;;  %v1186_v41 = vsub.f32 %v2354_v44, %v2364_v4 }
 0x58c   : > { %v1774_v10 = vpop.eup %1773  ;;  %1793 = vpow2.f32 %v1215_v43  ;;  %v1623_v13 = vpack.c.bf16 %v1772_v7, %v1768_v3  ;;  %v1239_v58 = vmul.f32 1.442695, %v1182_v22  ;;  %v1187_v15 = vsub.f32 %v2357_v25, %v2364_v4 }
 0x58d   : > { %v1776_v38 = vpop.eup %1775  ;;  %1795 = vpow2.f32 %v1217_v5  ;;  %v1621_v26 = vpack.c.bf16 %v1774_v10, %v1770_v57  ;;  %v1241_v33 = vmul.f32 1.442695, %v1183_v17  ;;  %v1188_v42 = vsub.f32 %v2360_v36, %v2364_v4 }
 0x58e   : > { %v1778_v40 = vpop.eup %1777  ;;  %1797 = vpow2.f32 %v1219_v61  ;;  %v1243_v62 = vmul.f32 1.442695, %v1184_v39  ;;  %v1245_v44 = vmul.f32 1.442695, %v1185_v19  ;;  %v1154_v53 = vsub.f32 %v2156_v2, %v2364_v4 }
 0x58f   : > { %v1780_v27 = vpop.eup %1779  ;;  %1799 = vpow2.f32 %v1221_v63  ;;  %1622 = vmatprep.subr.bf16.mxu1 %v1621_v26  ;;  %v1247_v1 = vmul.f32 1.442695, %v1186_v41  ;;  %v1249_v3 = vmul.f32 1.442695, %v1187_v15  ;;  %v1251_v36 = vmul.f32 1.442695, %v1188_v42 }
 0x590   : > { %v1782_v23 = vpop.eup %1781  ;;  %1801 = vpow2.f32 %v1223_v6  ;;  %1624 = vmatpush1.bf16.msra.mxu1 %v1623_v13  ;;  %v1627_v32 = vpack.c.bf16 %v1780_v27, %v1776_v38  ;;  %v1155_v59 = vmul.f32 1.442695, %v1154_v53  ;;  %v788_v27 = vmul.f32 0.0, %v2401_v51 }
 0x591   : > { %v1784_v29 = vpop.eup %1783  ;;  %1803 = vpow2.f32 %v1225_v8  ;;  %v1625_v52 = vpack.c.bf16 %v1782_v23, %v1778_v40 }
 0x592   : > { %v1786_v54 = vpop.eup %1785  ;;  %1805 = vpow2.f32 %v1227_v14  ;;  %v861_v23 = vadd.f32 %v2263_v30, %v788_v27  ;;  %v862_v22 = vadd.f32 %v2265_v48, %v788_v27 }
 0x593   : > { %v1788_v28 = vpop.eup %1787  ;;  %1807 = vpow2.f32 %v1229_v20  ;;  %1626 = vmatprep.subr.bf16.mxu1 %v1625_v52  ;;  %v390_v52 = vadd.f32 %v2026_v21, %v2204_v12 }
 0x594   : > { %v1790_v37 = vpop.eup %1789  ;;  %1809 = vpow2.f32 %v1231_v50  ;;  %1628 = vmatpush1.bf16.msra.mxu1 %v1627_v32  ;;  %v1631_v56 = vpack.c.bf16 %v1788_v28, %v1784_v29 }
 0x595   : > { %v1792_v60 = vpop.eup %1791  ;;  %1811 = vpow2.f32 %v1233_v46  ;;  %v1629_v35 = vpack.c.bf16 %v1790_v37, %v1786_v54  ;;  %v1335_v54 = vlaneseq }
 0x596   : > { %v1794_v45 = vpop.eup %1793  ;;  %1813 = vpow2.f32 %v1235_v31 }
 0x597   : > { %v1796_v47 = vpop.eup %1795  ;;  %1815 = vpow2.f32 %v1237_v34  ;;  %1630 = vmatprep.subr.bf16.mxu1 %v1629_v35  ;;  %v1336_v48 = vshrl.u32 %v1335_v54, 7 }
 0x598   : > { %v1798_v49 = vpop.eup %1797  ;;  %1817 = vpow2.f32 %v1239_v58  ;;  %1632 = vmatpush1.bf16.msra.mxu1 %v1631_v56  ;;  %v1635_v25 = vpack.c.bf16 %v1796_v47, %v1792_v60 }
 0x599   : > { %v1800_v43 = vpop.eup %1799  ;;  %1819 = vpow2.f32 %v1241_v33  ;;  %v1633_v55 = vpack.c.bf16 %v1798_v49, %v1794_v45  ;;  %v1337_v28 = vsub.s32 0, %v1336_v48  ;;  %v1341_v19 = vsub.s32 1, %v1336_v48  ;;  %v1360_v45 = vld [vmem:[%s2504_s4] sm:$0xf] }
 0x59a   : > { %v1802_v5 = vpop.eup %1801  ;;  %1821 = vpow2.f32 %v1243_v62  ;;  %v1441_v49 = vld [vmem:[%s269_s29] sm:$0xff] }
 0x59b   : > { %v1804_v57 = vpop.eup %1803  ;;  %1823 = vpow2.f32 %v1245_v44  ;;  %1634 = vmatprep.subr.bf16.mxu1 %v1633_v55 }
 0x59c   : > { %v1806_v61 = vpop.eup %1805  ;;  %1825 = vpow2.f32 %v1247_v1  ;;  %1636 = vmatpush1.bf16.msra.mxu1 %v1635_v25  ;;  %v1639_v2 = vpack.c.bf16 %v1804_v57, %v1800_v43 }
 0x59d   : > { %v1808_v4 = vpop.eup %1807  ;;  %1827 = vpow2.f32 %v1249_v3  ;;  %v1637_v7 = vpack.c.bf16 %v1806_v61, %v1802_v5 }
 0x59e   : > { %v1810_v9 = vpop.eup %1809  ;;  %1829 = vpow2.f32 %v1251_v36 }
 0x59f   : > { %v1812_v63 = vpop.eup %1811  ;;  %1638 = vmatprep.subr.bf16.mxu1 %v1637_v7  ;;  %1831 = vpow2.f32 %v1155_v59 }
 0x5a0   : > { %v1814_v10 = vpop.eup %1813  ;;  %1640 = vmatpush1.bf16.msra.mxu1 %v1639_v2  ;;  %v1643_v16 = vpack.c.bf16 %v1812_v63, %v1808_v4 }
 0x5a1   : > { %v1816_v6 = vpop.eup %1815  ;;  %v1641_v13 = vpack.c.bf16 %v1814_v10, %v1810_v9 }
 0x5a2   : > { %v1818_v38 = vpop.eup %1817 }
 0x5a3   : > { %v1820_v24 = vpop.eup %1819  ;;  %1642 = vmatprep.subr.bf16.mxu1 %v1641_v13 }
 0x5a4   : > { %v1822_v8 = vpop.eup %1821  ;;  %1644 = vmatpush1.bf16.msra.mxu1 %v1643_v16  ;;  %v1647_v26 = vpack.c.bf16 %v1820_v24, %v1816_v6 }
 0x5a5   : > { %v1824_v40 = vpop.eup %1823  ;;  %v1645_v11 = vpack.c.bf16 %v1822_v8, %v1818_v38 }
 0x5a6   : > { %v1826_v14 = vpop.eup %1825 }
 0x5a7   : > { %v1828_v18 = vpop.eup %1827  ;;  %1646 = vmatprep.subr.bf16.mxu1 %v1645_v11 }
 0x5a8   : > { %v1830_v20 = vpop.eup %1829  ;;  %1648 = vmatpush1.bf16.msra.mxu1 %v1647_v26  ;;  %v1651_v50 = vpack.c.bf16 %v1828_v18, %v1824_v40 }
 0x5a9   : > { %v1832_v32 = vpop.eup %1831  ;;  %v1649_v29 = vpack.c.bf16 %v1830_v20, %v1826_v14 }
 0x5aa   : > { %v1255_v17 = vmul.f32 %v1832_v32, %v861_v23  ;;  %v1256_v46 = vmul.f32 %v1832_v32, %v862_v22 }
 0x5ab   : > { %1650 = vmatprep.subr.bf16.mxu1 %v1649_v29 }
 0x5ac   : > { %1652 = vmatpush1.bf16.msra.mxu1 %v1651_v50 }
 0x5af   : > { %1322 = vmatmul.mubr.f32.vlgmr.msra.gmra.mrb[38].mxu1 %v390_v52 }
 0x5b0   : > { %1434 = vmatprep.mubr.f32.mxu1 %v1899_v0  ;;  %v1361_v0 = vld [vmem:[%s2505_s5] sm:$0xf] }
 0x682   : > { %v1323_v51 = vpop.f32.mrb[38].mxu1 }
 0x683   : > { %v1328_v39 = vadd.f32 %v1323_v51, %v1255_v17  ;;  %v1325_v30 = vpop.f32.mrb[39].mxu1 }
 0x684   : > { %v1329_v31 = vadd.f32 %v1325_v30, %v1256_v46 }
 0x685   : > { %1330 = vst [vmem:[#allocation5] sm:$0xff] %v1328_v39 }
 0x686   : > { %1331 = vst [vmem:[#allocation5 + $0x8] sm:$0xff] %v1329_v31 }
 0x68d   : > { %v1333_v34 = vld [vmem:[#allocation5 + $0x2] ss:$8 sm:$0x3] }
 0x68e   : > { %v1338_v37 = vrot.slane %v1333_v34, %v1337_v28  ;;  %v1342_v41 = vrot.slane %v1333_v34, %v1341_v19 }
 0x690   : > { %v1346_v58 = vsel %vm1345_vm3, %v1338_v37, 0.0  ;;  %v1347_v21 = vsel %vm1345_vm3, %v1342_v41, 0.0 }
 0x691   : > { %v1348_v12 = vadd.f32 %v1347_v21, %v1346_v58 }
 0x693   : > { %1349 = vadd.xlane.f32.xlu1 %v1348_v12 }
 0x6a4   : > { %1364 = vperm.xlu1 %1699, %v1361_v0  }
 0x720   : > { %v1350_v56 = vpop.xlane.xlu1 %1349 }
 0x721   : > { %1833 = vrcp.f32 %v1350_v56 }
 0x724   : > { %v1365_v42 = vpop.permute.xlu1 %1364 }
 0x72b   : > { %v1834_v60 = vpop.eup %1833 }
 0x72c   : > { %v1357_v15 = vrot.slane %v1834_v60, %v1337_v28 }
 0x72e   : > { %v1359_v33 = vmul.f32 %v1357_v15, %v1329_v31  ;;  %v1358_v35 = vmul.f32 %v1357_v15, %v1328_v39 }
 0x730   : > { %1370 = vmatprep.subr.mxu1 %v1359_v33 }
 0x731   : > { %1371 = vmatpush1.msra.mxu1 %v1358_v35 }
 0x732   : > { %1580 = vmatmul.mubr.msk.f32.vlgmr.msra.gmra.mrb[40].mxu1 %vm436_vm2, %v1360_v45 }
 0x805   : > { %v1436_v62 = vpop.f32.mrb[40].mxu1 }
 0x806   : > { %v1438_v47 = vpop.f32.mrb[41].mxu1  ;;  %v1437_v44 = vadd.f32 %v1436_v62, %v1365_v42 }
 0x807   : > { %v1439_v53 = vadd.f32 %v1438_v47, %v1365_v42 }
 0x809   : > { %v1444_v1 = vcombine.low %v1437_v44, %v1439_v53 }
 0x80b   : > { %v1446_v25 = vmul.f32 %v1444_v1, %v1441_v49 }
 0x80d   : > { %1447 = vst [vmem:[%s259_s10] sm:$0xff] %v1446_v25 }
 0x80e   : > { %1848 = shalt.err (!%p1845_p3)
}
 0x80f   : > { %s1849_s19 = scalar_lea.hbm %s2458_s16, 128  ;;  %s1853_s28 = scalar_lea.hbm %s2506_s6, 256 }
 0x810   : > { %p1850_p4 = scmp.ne.s32.totalorder %s2458_s16, %s1849_s19  ;;  %p1854_p9 = scmp.lt.u32.totalorder %s2458_s16, %s2506_s6 }
 0x811   : > { %p1855_p10 = scmp.lt.u32.totalorder %s1853_s28, %s1849_s19  ;;  %p1857_p12 = scmp.lt.u32.totalorder %s1849_s19, %s2458_s16 }
 0x812   : > { %p1851_p7 = pnand %p1850_p4, %p1975_p5 }
 0x813   : > { %p1856_p11 = por %p1855_p10, %p1854_p9 }
 0x814   : > { %p1852_p8 = pneg %p1851_p7 }
 0x815   : > { %p1858_p13 = por %p1857_p12, %p1856_p11 }
 0x817   : > { %p1859_p0 = pnand %p1858_p13, %p1852_p8 }
 0x819   : > { %1862 = shalt.err (!%p1859_p0)
}
 0x81a   : > { %1657 = dma.vmem_to_hbm [thread:$0]  (%p1975_p5), %s2460_s13, 128, %s2458_s16, %s1449_s11  }
 0x81b PF: > { %p1663_p1 = scmp.ge.s32.totalorder %s1897_s24, 2  ;;  %s1475_s10 = sand.u32 1, %s1885_s21  }
 0x81c   : > { %s1476_s14 = scalar_lea.sflag [#allocation7], %s1475_s10 }
 0x81d   : > { %p1660_p2 = pnand %p1663_p1, %p1979_p6 }
 0x81f   : > { %1880 = dma.done.wait (!%p1660_p2), %s1476_s14, 128  }
 0x820   : > { %1882 = vsyncadd (!%p1660_p2), %s1476_s14, 4294967168  ;;  %p16_p3 = scmp.ge.s32.totalorder %s1962_s27, 4   ;;  %s2509_s21 = smov %s1889_s22 }
 0x821   : > { %s2510_s22 = smov %s1893_s23  ;;  %s2511_s23 = smov %s1973_s30 }
 0x822   : > { %s2512_s24 = smov %s1962_s27  ;;  %18 = sbr.rel (!%p16_p3) target bundleno = 3 (0x3), region = 85 }
 0x829   :  { %1481 = vsyncpa [#allocation7], 1 }
 0x82a   :  { %1483 = vsyncpa [#allocation7 + $0x1], 1 }

</bundles_post_ra>
